<compile_context>
chip_gen: v5e
topology: v5e:2x2
jax: 0.10.0
libtpu: 0.0.40
codegen_flags: <defaults>
</compile_context>

<pallas_src>
import functools

import jax
import jax.numpy as jnp
from jax.experimental import pallas as pl
from jax.experimental.pallas import tpu as pltpu

NEURON = 100          # hidden width from the PyTorch module
PAD = 128             # lane-dense padded hidden width used inside the kernel


def _pinn_kernel(x_ref, rows_ref, wstk_ref, o_ref, *, mxu_dtype):
    # x_ref:    (TM, 1)  f32 collocation points (no lane padding).
    # rows_ref: (8, PAD) f32 -> [w1_row, b1, b2, b3, b4, w5_row, 0, 0].
    # wstk_ref: (3, PAD, PAD) in mxu_dtype (f32 or bf16) -> [w2, w3, w4].
    x = x_ref[...]                                             # (TM, 1)
    rows = rows_ref[...]                                       # (8, PAD)
    w1, b1 = rows[0:1, :], rows[1:2, :]
    b2, b3, b4 = rows[2:3, :], rows[3:4, :], rows[4:5, :]
    w5 = rows[5:6, :]

    # Layer 1: scalar input -> broadcast multiply on the VPU (no matmul).
    h = jnp.tanh(x * w1 + b1)                                  # (TM, PAD) f32

    # Hidden layers 2-4: 128x128 MXU matmuls (optionally bf16 in, f32 acc).
    # Padded lanes stay exactly 0 through tanh and the matmuls.
    h = jnp.dot(h.astype(mxu_dtype), wstk_ref[0],
                preferred_element_type=jnp.float32)
    h = jnp.tanh(h + b2)
    h = jnp.dot(h.astype(mxu_dtype), wstk_ref[1],
                preferred_element_type=jnp.float32)
    h = jnp.tanh(h + b3)
    h = jnp.dot(h.astype(mxu_dtype), wstk_ref[2],
                preferred_element_type=jnp.float32)
    h = jnp.tanh(h + b4)

    # Layer 5: (PAD -> 1) as elementwise multiply + lane (XLU) reduction.
    # (+ b5 is folded into the wrapper after the pallas_call.)
    o_ref[...] = jnp.sum(h * w5, axis=-1, keepdims=True)       # (TM, 1)


def init_pinn_params(key):
    """Deterministic params matching the PyTorch Linear shapes.

    PyTorch nn.Linear(fan_in, fan_out) uses U(-1/sqrt(fan_in), 1/sqrt(fan_in))
    for both weight and bias; we mirror that (stored as (in, out) for x @ W).
    """
    dims = [(1, NEURON), (NEURON, NEURON), (NEURON, NEURON),
            (NEURON, NEURON), (NEURON, 1)]
    params = []
    for (fan_in, fan_out) in dims:
        key, kw, kb = jax.random.split(key, 3)
        bound = 1.0 / jnp.sqrt(jnp.float32(fan_in))
        w = jax.random.uniform(kw, (fan_in, fan_out), jnp.float32, -bound, bound)
        b = jax.random.uniform(kb, (fan_out,), jnp.float32, -bound, bound)
        params.append((w, b))
    return params


def prepare_padded_params(params, mxu_dtype=jnp.float32):
    """Pad & pack weights/biases once, outside the per-call jitted path.

    mxu_dtype=jnp.bfloat16 enables bf16 hidden matmuls (faster on every TPU
    generation, ~1e-3 relative error); jnp.float32 keeps full parity.
    """
    (w1, b1), (w2, b2), (w3, b3), (w4, b4), (w5, b5) = params

    # Row block: [w1_row, b1, b2, b3, b4, w5_row, 0, 0] -> (8, PAD) f32.
    rows = jnp.zeros((8, PAD), jnp.float32)
    rows = rows.at[0, :NEURON].set(w1[0])          # W1 is (1,100) -> broadcast row
    rows = rows.at[1, :NEURON].set(b1)
    rows = rows.at[2, :NEURON].set(b2)
    rows = rows.at[3, :NEURON].set(b3)
    rows = rows.at[4, :NEURON].set(b4)
    rows = rows.at[5, :NEURON].set(w5[:, 0])       # W5 is (100,1) -> reduction row

    # Hidden weight stack: (3, PAD, PAD), zero padded, in the MXU dtype.
    wstack = jnp.zeros((3, PAD, PAD), jnp.float32)
    wstack = wstack.at[0, :NEURON, :NEURON].set(w2)
    wstack = wstack.at[1, :NEURON, :NEURON].set(w3)
    wstack = wstack.at[2, :NEURON, :NEURON].set(w4)
    wstack = wstack.astype(mxu_dtype)

    b5p = jnp.asarray(b5, jnp.float32).reshape(1, 1)
    return (rows, wstack, b5p)


def _round_up(x, m):
    return ((x + m - 1) // m) * m


def _cdiv(a, b):
    return (a + b - 1) // b


def _choose_tile(n, tm):
    """Tile size: multiple of 8, as large as possible, >= 2 tiles when N
    allows, and an even grid length when practical (v7x megacore balance)."""
    tm = max(8, (tm // 8) * 8)                 # clamp caller tm to multiple of 8
    n8 = _round_up(max(n, 1), 8)
    if n8 <= tm:
        if n8 >= 16:
            return _round_up(_cdiv(n8, 2), 8)  # split into 2 balanced tiles
        return n8                              # tiny batch: single tile
    num = _cdiv(n8, tm)
    if num % 2 == 1:
        num += 1                               # prefer an even grid for 2 TCs
    return _round_up(_cdiv(n8, num), 8)


@functools.partial(jax.jit, static_argnames=("tm",))
def _pinn_forward_impl(r, rows, wstack, b5, tm):
    n = r.shape[0]
    tm_eff = _choose_tile(n, tm)
    n_pad = _round_up(_round_up(max(n, 1), 8), tm_eff)

    # Slim (n_pad, 1) input -- no 128-lane zero padding of the batch.
    x = jnp.zeros((n_pad, 1), jnp.float32).at[:n, :].set(r)

    kernel = functools.partial(_pinn_kernel, mxu_dtype=wstack.dtype)

    out = pl.pallas_call(
        kernel,
        out_shape=jax.ShapeDtypeStruct((n_pad, 1), jnp.float32),
        grid_spec=pltpu.PrefetchScalarGridSpec(
            num_scalar_prefetch=0,
            grid=(n_pad // tm_eff,),
            in_specs=[
                pl.BlockSpec((tm_eff, 1), lambda i: (i, 0)),      # x tile
                pl.BlockSpec((8, PAD), lambda i: (0, 0)),         # packed rows
                pl.BlockSpec((3, PAD, PAD), lambda i: (0, 0, 0)), # w2/w3/w4
            ],
            out_specs=pl.BlockSpec((tm_eff, 1), lambda i: (i, 0)),
        ),
        compiler_params=pltpu.CompilerParams(
            dimension_semantics=("parallel",)),
    )(x, rows, wstack)

    # Final bias: single scalar, folded in the wrapper (no (1,1) VMEM operand).
    return out[:n, :] + b5


def pinn_forward(r, padded_params, tm=2048):
    """r: (N, 1) float32 -> (N, 1) float32, identical to PINN.forward."""
    rows, wstack, b5 = padded_params
    return _pinn_forward_impl(r, rows, wstack, b5, tm)


def pinn_forward_ref(r, params):
    """Pure-JAX reference of the PyTorch forward."""
    h = r
    for i, (w, b) in enumerate(params):
        h = h @ w + b
        if i < len(params) - 1:
            h = jnp.tanh(h)
    return h


if __name__ == "__main__":
    key = jax.random.PRNGKey(0)
    key, k_in, k_in2 = jax.random.split(key, 3)

    params = init_pinn_params(key)
    padded_f32 = prepare_padded_params(params, mxu_dtype=jnp.float32)
    padded_bf16 = prepare_padded_params(params, mxu_dtype=jnp.bfloat16)

    # Small batch of collocation points r in [0, 1), shape (8, 1).
    r = jax.random.uniform(k_in, (8, 1), jnp.float32)
    out = jax.block_until_ready(pinn_forward(r, padded_f32))
    ref = pinn_forward_ref(r, params)
    assert out.shape == (8, 1)
    assert jnp.allclose(out, ref, atol=1e-5, rtol=1e-5)

    # Larger, non-multiple-of-8 batch exercising padding + a multi-tile grid.
    r2 = jax.random.uniform(k_in2, (200, 1), jnp.float32)
    out2 = jax.block_until_ready(pinn_forward(r2, padded_f32))
    ref2 = pinn_forward_ref(r2, params)
    assert out2.shape == (200, 1)
    assert jnp.allclose(out2, ref2, atol=1e-5, rtol=1e-5)

    # bf16 hidden-matmul fast path (f32 accumulate): looser tolerance.
    out3 = jax.block_until_ready(pinn_forward(r2, padded_bf16))
    assert out3.shape == (200, 1)
    assert jnp.allclose(out3, ref2, atol=5e-2, rtol=5e-2)

    print("KERNEL_OK")
</pallas_src>

<mosaic_0001>
module attributes {stable_mosaic.version = 11 : i64} {
  func.func @_pinn_kernel(%arg0: i32, %arg1: memref<8x1xf32, #tpu.memory_space<vmem>>, %arg2: memref<8x128xf32, #tpu.memory_space<vmem>>, %arg3: memref<3x128x128xf32, #tpu.memory_space<vmem>>, %arg4: memref<8x1xf32, #tpu.memory_space<vmem>>) attributes {dimension_semantics = [#tpu.dimension_semantics<parallel>], iteration_bounds = array<i64: 1>, scalar_prefetch = 0 : i64, scratch_operands = 0 : i64, tpu.core_type = #tpu.core_type<tc>, window_params = [{transform_indices = @transform_0, window_bounds = array<i64: 8, 1>}, {pipeline_mode = #tpu.pipeline_mode<synchronous>, transform_indices = @transform_1, window_bounds = array<i64: 8, 128>}, {pipeline_mode = #tpu.pipeline_mode<synchronous>, transform_indices = @transform_2, window_bounds = array<i64: 3, 128, 128>}, {transform_indices = @transform_3, window_bounds = array<i64: 8, 1>}]} {
    %c0 = arith.constant 0 : index
    %c0_0 = arith.constant 0 : index
    %0 = vector.load %arg1[%c0, %c0_0] : memref<8x1xf32, #tpu.memory_space<vmem>>, vector<8x1xf32>
    %c0_1 = arith.constant 0 : index
    %c0_2 = arith.constant 0 : index
    %1 = vector.load %arg2[%c0_1, %c0_2] : memref<8x128xf32, #tpu.memory_space<vmem>>, vector<8x128xf32>
    %2 = vector.extract_strided_slice %1 {offsets = [0, 0], sizes = [1, 128], strides = [1, 1]} : vector<8x128xf32> to vector<1x128xf32>
    %3 = vector.extract_strided_slice %1 {offsets = [1, 0], sizes = [1, 128], strides = [1, 1]} : vector<8x128xf32> to vector<1x128xf32>
    %4 = vector.extract_strided_slice %1 {offsets = [2, 0], sizes = [1, 128], strides = [1, 1]} : vector<8x128xf32> to vector<1x128xf32>
    %5 = vector.extract_strided_slice %1 {offsets = [3, 0], sizes = [1, 128], strides = [1, 1]} : vector<8x128xf32> to vector<1x128xf32>
    %6 = vector.extract_strided_slice %1 {offsets = [4, 0], sizes = [1, 128], strides = [1, 1]} : vector<8x128xf32> to vector<1x128xf32>
    %7 = vector.extract_strided_slice %1 {offsets = [5, 0], sizes = [1, 128], strides = [1, 1]} : vector<8x128xf32> to vector<1x128xf32>
    %8 = vector.broadcast %0 : vector<8x1xf32> to vector<8x128xf32>
    %9 = vector.broadcast %2 : vector<1x128xf32> to vector<8x128xf32>
    %10 = arith.mulf %8, %9 : vector<8x128xf32>
    %11 = vector.broadcast %3 : vector<1x128xf32> to vector<8x128xf32>
    %12 = arith.addf %10, %11 : vector<8x128xf32>
    %13 = math.tanh %12 : vector<8x128xf32>
    %c0_3 = arith.constant 0 : index
    %c0_4 = arith.constant 0 : index
    %c0_5 = arith.constant 0 : index
    %14 = vector.load %arg3[%c0_3, %c0_4, %c0_5] : memref<3x128x128xf32, #tpu.memory_space<vmem>>, vector<1x128x128xf32>
    %15 = vector.shape_cast %14 : vector<1x128x128xf32> to vector<128x128xf32>
    %cst = arith.constant dense<0.000000e+00> : vector<8x128xf32>
    %16 = tpu.matmul %13, %15, %cst {dimension_numbers = #tpu.dot_dimension_numbers<[1], [0], [0], [1], [0, 0, 1, 1], [], []>} : vector<8x128xf32>, vector<128x128xf32>, vector<8x128xf32> -> vector<8x128xf32>
    %17 = vector.broadcast %4 : vector<1x128xf32> to vector<8x128xf32>
    %18 = arith.addf %16, %17 : vector<8x128xf32>
    %19 = math.tanh %18 : vector<8x128xf32>
    %c1 = arith.constant 1 : index
    %c0_6 = arith.constant 0 : index
    %c0_7 = arith.constant 0 : index
    %20 = vector.load %arg3[%c1, %c0_6, %c0_7] : memref<3x128x128xf32, #tpu.memory_space<vmem>>, vector<1x128x128xf32>
    %21 = vector.shape_cast %20 : vector<1x128x128xf32> to vector<128x128xf32>
    %cst_8 = arith.constant dense<0.000000e+00> : vector<8x128xf32>
    %22 = tpu.matmul %19, %21, %cst_8 {dimension_numbers = #tpu.dot_dimension_numbers<[1], [0], [0], [1], [0, 0, 1, 1], [], []>} : vector<8x128xf32>, vector<128x128xf32>, vector<8x128xf32> -> vector<8x128xf32>
    %23 = vector.broadcast %5 : vector<1x128xf32> to vector<8x128xf32>
    %24 = arith.addf %22, %23 : vector<8x128xf32>
    %25 = math.tanh %24 : vector<8x128xf32>
    %c2 = arith.constant 2 : index
    %c0_9 = arith.constant 0 : index
    %c0_10 = arith.constant 0 : index
    %26 = vector.load %arg3[%c2, %c0_9, %c0_10] : memref<3x128x128xf32, #tpu.memory_space<vmem>>, vector<1x128x128xf32>
    %27 = vector.shape_cast %26 : vector<1x128x128xf32> to vector<128x128xf32>
    %cst_11 = arith.constant dense<0.000000e+00> : vector<8x128xf32>
    %28 = tpu.matmul %25, %27, %cst_11 {dimension_numbers = #tpu.dot_dimension_numbers<[1], [0], [0], [1], [0, 0, 1, 1], [], []>} : vector<8x128xf32>, vector<128x128xf32>, vector<8x128xf32> -> vector<8x128xf32>
    %29 = vector.broadcast %6 : vector<1x128xf32> to vector<8x128xf32>
    %30 = arith.addf %28, %29 : vector<8x128xf32>
    %31 = math.tanh %30 : vector<8x128xf32>
    %32 = vector.broadcast %7 : vector<1x128xf32> to vector<8x128xf32>
    %33 = arith.mulf %31, %32 : vector<8x128xf32>
    %cst_12 = arith.constant dense<0.000000e+00> : vector<8xf32>
    %34 = vector.multi_reduction <add>, %33, %cst_12 [1] : vector<8x128xf32> to vector<8xf32>
    %35 = vector.shape_cast %34 : vector<8xf32> to vector<8x1xf32>
    %c0_13 = arith.constant 0 : index
    %c0_14 = arith.constant 0 : index
    %36 = vector.load %arg4[%c0_13, %c0_14] : memref<8x1xf32, #tpu.memory_space<vmem>>, vector<8x1xf32>
    tpu.vector_store %arg4[%c0_13, %c0_14], %35 {strides = array<i32>} : memref<8x1xf32, #tpu.memory_space<vmem>>, vector<8x1xf32>,
    return
  }
  func.func @transform_0(%arg0: i32) -> (i32, i32) {
    %c0_i32 = arith.constant 0 : i32
    %c0_i32_0 = arith.constant 0 : i32
    return %arg0, %c0_i32 : i32, i32
  }
  func.func @transform_1(%arg0: i32) -> (i32, i32) {
    %c0_i32 = arith.constant 0 : i32
    %c0_i32_0 = arith.constant 0 : i32
    %c0_i32_1 = arith.constant 0 : i32
    return %c0_i32, %c0_i32_0 : i32, i32
  }
  func.func @transform_2(%arg0: i32) -> (i32, i32, i32) {
    %c0_i32 = arith.constant 0 : i32
    %c0_i32_0 = arith.constant 0 : i32
    %c0_i32_1 = arith.constant 0 : i32
    %c0_i32_2 = arith.constant 0 : i32
    return %c0_i32, %c0_i32_0, %c0_i32_1 : i32, i32, i32
  }
  func.func @transform_3(%arg0: i32) -> (i32, i32) {
    %c0_i32 = arith.constant 0 : i32
    %c0_i32_0 = arith.constant 0 : i32
    return %arg0, %c0_i32 : i32, i32
  }
}

</mosaic_0001>

<bundles_post_ra>
// kernel: _pinn_forward_impl.1
= control target key start
LH: loop header
LB: loop body
LE: loop exit
PB: predicated region body
PF: predicated region fallthrough
CT: control target
= control target key end

     0   :  { %8 = vsyncpa [#allocation3], 0  ;;  %s208_s15 = smov [#allocation2]   ;;  %s209_s17 = smov 128   ;;  %s252_s0 = inlined_call_operand.vmem [shape: f32[8,1], index: 0, kind: input, shape index: {}]   ;;  %s253_s1 = inlined_call_operand.vmem [shape: f32[8,128], index: 1, kind: input, shape index: {}]   ;;  %s254_s2 = inlined_call_operand.hbm [shape: f32[3,128,128], index: 2, kind: input, shape index: {}]   ;;  %s255_s3 = inlined_call_operand.vmem [shape: f32[8,1], index: 3, kind: output, shape index: {}]  }
   0x1   :  { %s17_s14 = sshll.u32 %s254_s2, 4  ;;  %s19_s16 = sshll.u32 %s208_s15, 4  ;;  %s18_s14 = int_to_ptr.hbm [resolvable:$true] %s17_s14  ;;  %s20_s16 = int_to_ptr.vmem [resolvable:$true] %s19_s16 }
   0x2   :  { %s210_s18 = smov 8  }
   0x3   :  { %25 = dma.hbm_to_vmem [thread:$0]  %s18_s14, 6144, %s20_s16, [#allocation3], %s209_s17, %s209_s17, %s210_s18  }
   0x4   :  { %206 = dma.done.wait [#allocation3], 6144  }
   0x5   :  { %207 = vsyncadd [#allocation3], 4294961152  ;;  %v211_v0 = vmov 0   ;;  %v30_v1 = vld [vmem:[%s252_s0] sm:$0xff]  ;;  %v57_v2 = vld [vmem:[#allocation2 + $0x78] sm:$0xff]  ;;  %vm162_vm0 = vcmask 7168  }
   0x6   :  { %173 = vset.pattern.permute.xlu0 %v211_v0  ;;  %v56_v3 = vld [vmem:[#allocation2 + $0x70] sm:$0xff]  ;;  %59 = vmatpush.msra.mxu0 %v57_v2  ;;  %v55_v4 = vld [vmem:[#allocation2 + $0x68] sm:$0xff]  ;;  %v54_v5 = vld [vmem:[#allocation2 + $0x60] sm:$0xff] }
   0x7   :  { %34 = vperm.xlu0 %173, %v30_v1   ;;  %v53_v6 = vld [vmem:[#allocation2 + $0x58] sm:$0xff]  ;;  %v52_v7 = vld [vmem:[#allocation2 + $0x50] sm:$0xff]  ;;  %v51_v8 = vld [vmem:[#allocation2 + $0x48] sm:$0xff] }
   0x8   :  { %60 = vmatpush.msra.mxu0 %v56_v3  ;;  %v50_v9 = vld [vmem:[#allocation2 + $0x40] sm:$0xff]  ;;  %v49_v10 = vld [vmem:[#allocation2 + $0x38] sm:$0xff]  ;;  %v48_v11 = vld [vmem:[#allocation2 + $0x30] sm:$0xff] }
   0x9   :  { %v47_v12 = vld [vmem:[#allocation2 + $0x28] sm:$0xff]  ;;  %v46_v13 = vld [vmem:[#allocation2 + $0x20] sm:$0xff]  ;;  %v45_v14 = vld [vmem:[#allocation2 + $0x18] sm:$0xff] }
   0xa   :  { %61 = vmatpush.msra.mxu0 %v55_v4  ;;  %v44_v15 = vld [vmem:[#allocation2 + $0x10] sm:$0xff]  ;;  %v43_v16 = vld [vmem:[#allocation2 + $0x8] sm:$0xff]  ;;  %v42_v17 = vld [vmem:[#allocation2] sm:$0xff] }
   0xb   :  { %v96_v18 = vld [vmem:[#allocation2 + $0xf8] sm:$0xff]  ;;  %v95_v19 = vld [vmem:[#allocation2 + $0xf0] sm:$0xff]  ;;  %v94_v20 = vld [vmem:[#allocation2 + $0xe8] sm:$0xff] }
   0xc   :  { %62 = vmatpush.msra.mxu0 %v54_v5  ;;  %98 = vmatpush.msra.mxu1 %v96_v18  ;;  %v93_v21 = vld [vmem:[#allocation2 + $0xe0] sm:$0xff]  ;;  %v92_v22 = vld [vmem:[#allocation2 + $0xd8] sm:$0xff]  ;;  %v91_v23 = vld [vmem:[#allocation2 + $0xd0] sm:$0xff] }
   0xd   :  { %v90_v24 = vld [vmem:[#allocation2 + $0xc8] sm:$0xff]  ;;  %v89_v25 = vld [vmem:[#allocation2 + $0xc0] sm:$0xff]  ;;  %v88_v27 = vld [vmem:[#allocation2 + $0xb8] sm:$0xff] }
   0xe   :  { %63 = vmatpush.msra.mxu0 %v53_v6  ;;  %99 = vmatpush.msra.mxu1 %v95_v19  ;;  %v241_v26 = vld [vmem:[%s253_s1] sm:$0xff]  ;;  %v87_v28 = vld [vmem:[#allocation2 + $0xb0] sm:$0xff]  ;;  %v86_v30 = vld [vmem:[#allocation2 + $0xa8] sm:$0xff] }
   0xf   :  { %v37_v29 = vperm.slane %v241_v26, 0  ;;  %v39_v31 = vperm.slane %v241_v26, 1  ;;  %v85_v36 = vld [vmem:[#allocation2 + $0xa0] sm:$0xff]  ;;  %v84_v37 = vld [vmem:[#allocation2 + $0x98] sm:$0xff]  ;;  %v83_v38 = vld [vmem:[#allocation2 + $0x90] sm:$0xff]  ;;  %v58_v52 = vperm.slane %v241_v26, 2 }
  0x10   :  { %64 = vmatpush.msra.mxu0 %v52_v7  ;;  %100 = vmatpush.msra.mxu1 %v94_v20  ;;  %v82_v39 = vld [vmem:[#allocation2 + $0x88] sm:$0xff]  ;;  %v81_v40 = vld [vmem:[#allocation2 + $0x80] sm:$0xff]  ;;  %v135_v41 = vld [vmem:[#allocation2 + $0x178] sm:$0xff]  ;;  %v97_v61 = vperm.slane %v241_v26, 3  ;;  %v136_v1 = vperm.slane %v241_v26, 4  ;;  %v158_v4 = vperm.slane %v241_v26, 5 }
  0x11   :  { %v134_v42 = vld [vmem:[#allocation2 + $0x170] sm:$0xff]  ;;  %137 = vmatpush.msra.mxu2 %v135_v41  ;;  %v133_v43 = vld [vmem:[#allocation2 + $0x168] sm:$0xff]  ;;  %v132_v44 = vld [vmem:[#allocation2 + $0x160] sm:$0xff] }
  0x12   :  { %65 = vmatpush.msra.mxu0 %v51_v8  ;;  %101 = vmatpush.msra.mxu1 %v93_v21  ;;  %v131_v45 = vld [vmem:[#allocation2 + $0x158] sm:$0xff]  ;;  %v130_v46 = vld [vmem:[#allocation2 + $0x150] sm:$0xff]  ;;  %v129_v47 = vld [vmem:[#allocation2 + $0x148] sm:$0xff] }
  0x13   :  { %138 = vmatpush.msra.mxu2 %v134_v42  ;;  %v128_v48 = vld [vmem:[#allocation2 + $0x140] sm:$0xff]  ;;  %v127_v49 = vld [vmem:[#allocation2 + $0x138] sm:$0xff]  ;;  %v126_v50 = vld [vmem:[#allocation2 + $0x130] sm:$0xff] }
  0x14   :  { %66 = vmatpush.msra.mxu0 %v50_v9  ;;  %102 = vmatpush.msra.mxu1 %v92_v22  ;;  %v125_v51 = vld [vmem:[#allocation2 + $0x128] sm:$0xff]  ;;  %v124_v56 = vld [vmem:[#allocation2 + $0x120] sm:$0xff]  ;;  %v123_v57 = vld [vmem:[#allocation2 + $0x118] sm:$0xff] }
  0x15   :  { %139 = vmatpush.msra.mxu2 %v133_v43  ;;  %v122_v58 = vld [vmem:[#allocation2 + $0x110] sm:$0xff]  ;;  %v121_v59 = vld [vmem:[#allocation2 + $0x108] sm:$0xff]  ;;  %v120_v60 = vld [vmem:[#allocation2 + $0x100] sm:$0xff] }
  0x16   :  { %67 = vmatpush.msra.mxu0 %v49_v10  ;;  %103 = vmatpush.msra.mxu1 %v91_v23 }
  0x17   :  { %140 = vmatpush.msra.mxu2 %v132_v44 }
  0x18   :  { %68 = vmatpush.msra.mxu0 %v48_v11  ;;  %104 = vmatpush.msra.mxu1 %v90_v24 }
  0x19   :  { %141 = vmatpush.msra.mxu2 %v131_v45 }
  0x1a   :  { %69 = vmatpush.msra.mxu0 %v47_v12  ;;  %105 = vmatpush.msra.mxu1 %v89_v25 }
  0x1b   :  { %142 = vmatpush.msra.mxu2 %v130_v46 }
  0x1c   :  { %70 = vmatpush.msra.mxu0 %v46_v13  ;;  %106 = vmatpush.msra.mxu1 %v88_v27 }
  0x1d   :  { %143 = vmatpush.msra.mxu2 %v129_v47 }
  0x1e   :  { %71 = vmatpush.msra.mxu0 %v45_v14  ;;  %107 = vmatpush.msra.mxu1 %v87_v28 }
  0x1f   :  { %144 = vmatpush.msra.mxu2 %v128_v48 }
  0x20   :  { %72 = vmatpush.msra.mxu0 %v44_v15  ;;  %108 = vmatpush.msra.mxu1 %v86_v30 }
  0x21   :  { %145 = vmatpush.msra.mxu2 %v127_v49 }
  0x22   :  { %73 = vmatpush.msra.mxu0 %v43_v16  ;;  %109 = vmatpush.msra.mxu1 %v85_v36 }
  0x23   :  { %146 = vmatpush.msra.mxu2 %v126_v50 }
  0x24   :  { %74 = vmatpush.msra.mxu0 %v42_v17  ;;  %110 = vmatpush.msra.mxu1 %v84_v37 }
  0x25   :  { %147 = vmatpush.msra.mxu2 %v125_v51 }
  0x26   :  { %111 = vmatpush.msra.mxu1 %v83_v38 }
  0x27   :  { %148 = vmatpush.msra.mxu2 %v124_v56 }
  0x28   :  { %112 = vmatpush.msra.mxu1 %v82_v39 }
  0x29   :  { %149 = vmatpush.msra.mxu2 %v123_v57 }
  0x2a   :  { %113 = vmatpush.msra.mxu1 %v81_v40 }
  0x2b   :  { %150 = vmatpush.msra.mxu2 %v122_v58 }
  0x2d   :  { %151 = vmatpush.msra.mxu2 %v121_v59 }
  0x2f   :  { %152 = vmatpush.msra.mxu2 %v120_v60 }
  0x79   :  { %v35_v32 = vpop.permute.xlu0 %34 }
  0x7a   :  { %v38_v33 = vmul.f32 %v37_v29, %v35_v32 }
  0x7c   :  { %v40_v34 = vadd.f32 %v39_v31, %v38_v33 }
  0x7e   :  { %174 = vtanh.f32 %v40_v34 }
  0x84   :  { %v175_v35 = vpop.eup %174 }
  0x85   :  { %75 = vmatmul.f32.vlgmr.msra.gmra.mxu0 %v175_v35 }
 0x102   :  { %v76_v53 = vpop.f32.mrf.mxu0 }
 0x103   :  { %v77_v54 = vadd.f32 %v76_v53, %v58_v52 }
 0x105   :  { %176 = vtanh.f32 %v77_v54 }
 0x10b   :  { %v177_v55 = vpop.eup %176 }
 0x10c   :  { %114 = vmatmul.f32.vlgmr.msra.gmra.mxu1 %v177_v55 }
 0x189   :  { %v115_v62 = vpop.f32.mrf.mxu1 }
 0x18a   :  { %v116_v63 = vadd.f32 %v115_v62, %v97_v61 }
 0x18c   :  { %178 = vtanh.f32 %v116_v63 }
 0x192   :  { %v179_v0 = vpop.eup %178 }
 0x193   :  { %153 = vmatmul.f32.vlgmr.msra.gmra.mxu2 %v179_v0 }
 0x216   :  { %v154_v2 = vpop.f32.mrf.mxu2 }
 0x217   :  { %v155_v3 = vadd.f32 %v154_v2, %v136_v1 }
 0x219   :  { %180 = vtanh.f32 %v155_v3 }
 0x21f   :  { %v181_v5 = vpop.eup %180 }
 0x220   :  { %v159_v6 = vmul.f32 %v181_v5, %v158_v4 }
 0x222   :  { %160 = vadd.xlane.f32.xlu0 %v159_v6 }
 0x295   :  { %v161_v7 = vpop.xlane.xlu0 %160 }
 0x296   :  { %163 = vst.msk [vmem:[%s255_s3] sm:$0xff] %vm162_vm0, %v161_v7 }
 0x297   :  { %168 = vsyncpa [#allocation3], 1 }

</bundles_post_ra>
